<compile_context>
chip_gen: v7x
topology: tpu7x:2x2x1
jax: 0.10.0
libtpu: 0.0.40
codegen_flags: <defaults>
</compile_context>

<pallas_src>
import functools

import jax
import jax.numpy as jnp
from jax.experimental import pallas as pl
from jax.experimental.pallas import tpu as pltpu

LANE = 128
TB_ALIGN = 16          # batch-tile alignment (bf16 sublane packing = 16 rows / vreg)


def _round_up(v, m):
    return ((v + m - 1) // m) * m


# ---------------------------------------------------------------------------
# Fused kernel: LayerNorm -> (Linear -> ReLU)* -> Linear [-> ReLU if activate_final]
# ---------------------------------------------------------------------------
def _fused_mlp_kernel(*refs, n_layers, use_layer_norm, activate_final, valid_in):
    idx = 0
    x_ref = refs[idx]; idx += 1
    if use_layer_norm:
        g_ref = refs[idx]; b_ref = refs[idx + 1]; idx += 2
    layer_refs = [(refs[idx + 2 * i], refs[idx + 2 * i + 1]) for i in range(n_layers)]
    o_ref = refs[idx + 2 * n_layers]

    if use_layer_norm:
        x = x_ref[...].astype(jnp.float32)            # bf16 stream -> f32 for stats
        inv_n = 1.0 / float(valid_in)
        # Padded columns of x are exactly zero, so plain row sums give the unpadded
        # statistics -- no iota / compare / mask multiplies needed.
        mean = jnp.sum(x, axis=-1, keepdims=True) * inv_n
        ex2 = jnp.sum(x * x, axis=-1, keepdims=True) * inv_n
        var = jnp.maximum(ex2 - mean * mean, 0.0)
        xn = (x - mean) * jax.lax.rsqrt(var + 1e-5)
        # gamma/beta are zero in the padded columns -> padded cols return to exactly 0.
        x = xn * g_ref[...].astype(jnp.float32) + b_ref[...].astype(jnp.float32)
        h = x.astype(jnp.bfloat16)
    else:
        h = x_ref[...]                                 # already bf16

    y = None
    for i, (w_ref, bias_ref) in enumerate(layer_refs):
        # bf16 MXU matmul, f32 accumulation; f32 epilogue (bias + ReLU).
        y = jnp.dot(h, w_ref[...], preferred_element_type=jnp.float32)
        y = y + bias_ref[...].astype(jnp.float32)
        if (i + 1 < n_layers) or activate_final:
            y = jnp.maximum(y, 0.0)
        if i + 1 < n_layers:
            h = y.astype(jnp.bfloat16)                 # bf16 carry between layers

    o_ref[...] = y.astype(o_ref.dtype)
    # TODO(synk): nn.Dropout omitted -- forward(training=False) makes it a no-op;
    #             scale_final is never applied in the reference forward.


# ---------------------------------------------------------------------------
# Parameter construction (PyTorch nn.Linear / nn.LayerNorm defaults), pre-padded to
# lane-dense (multiple-of-128) feature dims; weights stored bf16 and transposed to
# (in, out) so the kernel computes y = x @ W + b directly.
# ---------------------------------------------------------------------------
def init_mlp_params(key, in_dim, hidden_dims, use_layer_norm):
    params = {"in_dim": in_dim,
              "hidden_dims": tuple(hidden_dims),
              "use_layer_norm": use_layer_norm}

    d = in_dim
    dp = _round_up(in_dim, LANE)
    if use_layer_norm:
        gamma = jnp.ones((in_dim,), jnp.float32)
        beta = jnp.zeros((in_dim,), jnp.float32)
        params["ln_gamma"] = jnp.zeros((1, dp), jnp.float32).at[0, :in_dim].set(gamma)
        params["ln_beta"] = jnp.zeros((1, dp), jnp.float32).at[0, :in_dim].set(beta)

    layers, ref_layers = [], []
    for size in hidden_dims:
        key, wk, bk = jax.random.split(key, 3)
        bound = 1.0 / (d ** 0.5)
        w = jax.random.uniform(wk, (size, d), jnp.float32, -bound, bound)   # torch (out, in)
        b = jax.random.uniform(bk, (size,), jnp.float32, -bound, bound)
        np_ = _round_up(size, LANE)
        w_t = w.T                                                           # (in, out)
        w_pad = jnp.zeros((dp, np_), jnp.bfloat16).at[:d, :size].set(
            w_t.astype(jnp.bfloat16))
        b_pad = jnp.zeros((1, np_), jnp.float32).at[0, :size].set(b)
        layers.append({"w": w_pad, "b": b_pad})
        ref_layers.append({"w_t": w_t, "b": b})
        d, dp = size, np_

    params["layers"] = layers
    params["ref_layers"] = ref_layers        # unpadded f32, for the reference check
    return params


# ---------------------------------------------------------------------------
# Forward: one fused pallas_call, batch-tiled grid, weights resident in VMEM.
# ---------------------------------------------------------------------------
def mlp_forward(params, x, activate_final=False, block_b=256):
    B, D = x.shape
    assert D == params["in_dim"]
    use_ln = params["use_layer_norm"]
    layers = params["layers"]
    n_layers = len(layers)
    assert n_layers >= 1

    Dp = _round_up(D, LANE)
    Np = layers[-1]["w"].shape[1]            # padded output width (multiple of 128)

    # --- batch tiling: whole (padded) batch in one step when it fits the tile budget ---
    block_b = _round_up(max(block_b, TB_ALIGN), TB_ALIGN)
    Bp_min = _round_up(B, TB_ALIGN)
    TB = Bp_min if Bp_min <= block_b else block_b
    Bp = _round_up(B, TB)
    num_steps = Bp // TB

    # --- bf16 activation streaming ---
    x_pad = jnp.zeros((Bp, Dp), jnp.bfloat16).at[:B, :D].set(x.astype(jnp.bfloat16))

    # --- VMEM budget / fit check (resident weights are single-buffered) ---
    widest = max([Dp] + [l["w"].shape[1] for l in layers])
    resident = sum(int(l["w"].size) * 2 + int(l["b"].size) * 4 for l in layers)
    if use_ln:
        resident += 2 * Dp * 4
    streamed = 2 * TB * Dp * 2 + 2 * TB * Np * 2      # double-buffered bf16 in/out tiles
    scratch = 3 * TB * widest * 4                     # f32 LN / activation temporaries
    needed = resident + streamed + scratch + (4 << 20)

    try:
        vmem_cap = int(pltpu.get_tpu_info().vmem_capacity_bytes)
    except Exception:
        vmem_cap = 64 << 20                           # v7x per-core lower bound
    budget = int(vmem_cap * 0.85)
    if needed > budget:
        # TODO(synk): add an output-dim tiling grid axis over the widest layer instead of
        # shrinking TB when the all-weights-resident layout exceeds VMEM (v7x: 64 MiB).
        raise ValueError(
            f"resident-weight MLP needs ~{needed >> 20} MiB VMEM, budget {budget >> 20} MiB")
    vmem_limit = int(min(max(needed, 32 << 20), budget))

    operands = [x_pad]
    if use_ln:
        operands += [params["ln_gamma"], params["ln_beta"]]
    for layer in layers:
        operands += [layer["w"], layer["b"]]

    def build_specs(single_buffer_resident):
        res_kw = {"pipeline_mode": pl.Buffered(1)} if single_buffer_resident else {}
        specs = [pl.BlockSpec((TB, Dp), lambda i: (i, 0))]          # streamed over batch
        if use_ln:
            specs += [pl.BlockSpec((1, Dp), lambda i: (0, 0), **res_kw),
                      pl.BlockSpec((1, Dp), lambda i: (0, 0), **res_kw)]
        for layer in layers:
            kp, np_ = layer["w"].shape
            specs += [pl.BlockSpec((kp, np_), lambda i: (0, 0), **res_kw),  # VMEM-resident
                      pl.BlockSpec((1, np_), lambda i: (0, 0), **res_kw)]
        return specs

    kernel = functools.partial(
        _fused_mlp_kernel,
        n_layers=n_layers,
        use_layer_norm=use_ln,
        activate_final=activate_final,
        valid_in=D,
    )

    # Few-step grids: keep a single core warm instead of duplicating the weight DMA
    # into both v7x TensorCores; many-step grids: split across cores.
    semantics = ("parallel",) if num_steps >= 4 else ("arbitrary",)

    def run(in_specs):
        return pl.pallas_call(
            kernel,
            out_shape=jax.ShapeDtypeStruct((Bp, Np), jnp.bfloat16),
            grid_spec=pl.GridSpec(
                grid=(num_steps,),
                in_specs=in_specs,
                out_specs=pl.BlockSpec((TB, Np), lambda i: (i, 0)),
            ),
            compiler_params=pltpu.CompilerParams(
                dimension_semantics=semantics,
                vmem_limit_bytes=vmem_limit,
            ),
        )(*operands)

    try:
        out = run(build_specs(True))
    except Exception:
        # Fallback for jax builds where pipeline_mode is not plumbed through pallas_call;
        # identical semantics, just default double-buffering of the resident operands.
        out = run(build_specs(False))

    n_out = params["hidden_dims"][-1]
    return out[:B, :n_out]


# ---------------------------------------------------------------------------
# Pure-JAX reference mirroring the kernel's numerics (bf16 stream / bf16 MXU / f32 acc).
# ---------------------------------------------------------------------------
def ref_forward(params, x, activate_final=False):
    h = x.astype(jnp.bfloat16).astype(jnp.float32)
    if params["use_layer_norm"]:
        d = params["in_dim"]
        g = params["ln_gamma"][0, :d]
        b = params["ln_beta"][0, :d]
        mean = h.mean(-1, keepdims=True)
        var = jnp.maximum((h * h).mean(-1, keepdims=True) - mean * mean, 0.0)
        h = (h - mean) * jax.lax.rsqrt(var + 1e-5) * g + b
    h = h.astype(jnp.bfloat16)
    n = len(params["ref_layers"])
    for i, layer in enumerate(params["ref_layers"]):
        y = jnp.dot(h, layer["w_t"].astype(jnp.bfloat16),
                    preferred_element_type=jnp.float32) + layer["b"]
        if (i + 1 < n) or activate_final:
            y = jnp.maximum(y, 0.0)
        h = y.astype(jnp.bfloat16)
    return h


# ---------------------------------------------------------------------------
if __name__ == "__main__":
    key = jax.random.PRNGKey(0)
    B, in_dim = 64, 32
    hidden_dims = (64, 32)

    key, xkey, pkey = jax.random.split(key, 3)
    x = jax.random.normal(xkey, (B, in_dim), jnp.float32)

    params = init_mlp_params(pkey, in_dim, hidden_dims, use_layer_norm=True)

    out = mlp_forward(params, x, activate_final=False)
    out = jax.block_until_ready(out)

    r = ref_forward(params, x, activate_final=False)

    assert out.shape == (B, hidden_dims[-1]), out.shape
    err = float(jnp.max(jnp.abs(out.astype(jnp.float32) - r.astype(jnp.float32))))
    assert err < 2e-2, err
    print("KERNEL_OK")
</pallas_src>

<mosaic_0001>
module attributes {stable_mosaic.version = 11 : i64} {
  func.func @_fused_mlp_kernel(%arg0: i32, %arg1: memref<64x128xbf16, #tpu.memory_space<vmem>>, %arg2: memref<1x128xf32, #tpu.memory_space<vmem>>, %arg3: memref<1x128xf32, #tpu.memory_space<vmem>>, %arg4: memref<128x128xbf16, #tpu.memory_space<vmem>>, %arg5: memref<1x128xf32, #tpu.memory_space<vmem>>, %arg6: memref<128x128xbf16, #tpu.memory_space<vmem>>, %arg7: memref<1x128xf32, #tpu.memory_space<vmem>>, %arg8: memref<64x128xbf16, #tpu.memory_space<vmem>>) attributes {dimension_semantics = [#tpu.dimension_semantics<arbitrary>], iteration_bounds = array<i64: 1>, scalar_prefetch = 0 : i64, scratch_operands = 0 : i64, tpu.core_type = #tpu.core_type<tc>, window_params = [{transform_indices = @transform_0, window_bounds = array<i64: 64, 128>}, {pipeline_mode = #tpu.pipeline_mode<synchronous>, transform_indices = @transform_1, window_bounds = array<i64: 1, 128>}, {pipeline_mode = #tpu.pipeline_mode<synchronous>, transform_indices = @transform_2, window_bounds = array<i64: 1, 128>}, {pipeline_mode = #tpu.pipeline_mode<synchronous>, transform_indices = @transform_3, window_bounds = array<i64: 128, 128>}, {pipeline_mode = #tpu.pipeline_mode<synchronous>, transform_indices = @transform_4, window_bounds = array<i64: 1, 128>}, {pipeline_mode = #tpu.pipeline_mode<synchronous>, transform_indices = @transform_5, window_bounds = array<i64: 128, 128>}, {pipeline_mode = #tpu.pipeline_mode<synchronous>, transform_indices = @transform_6, window_bounds = array<i64: 1, 128>}, {transform_indices = @transform_7, window_bounds = array<i64: 64, 128>}]} {
    %c0 = arith.constant 0 : index
    %c0_0 = arith.constant 0 : index
    %0 = vector.load %arg1[%c0, %c0_0] : memref<64x128xbf16, #tpu.memory_space<vmem>>, vector<64x128xbf16>
    %1 = arith.extf %0 : vector<64x128xbf16> to vector<64x128xf32>
    %cst = arith.constant dense<0.000000e+00> : vector<64xf32>
    %2 = vector.multi_reduction <add>, %1, %cst [1] : vector<64x128xf32> to vector<64xf32>
    %3 = vector.shape_cast %2 : vector<64xf32> to vector<64x1xf32>
    %cst_1 = arith.constant 3.125000e-02 : f32
    %4 = vector.broadcast %cst_1 : f32 to vector<64x1xf32>
    %5 = arith.mulf %3, %4 : vector<64x1xf32>
    %6 = arith.mulf %1, %1 : vector<64x128xf32>
    %cst_2 = arith.constant dense<0.000000e+00> : vector<64xf32>
    %7 = vector.multi_reduction <add>, %6, %cst_2 [1] : vector<64x128xf32> to vector<64xf32>
    %8 = vector.shape_cast %7 : vector<64xf32> to vector<64x1xf32>
    %cst_3 = arith.constant 3.125000e-02 : f32
    %9 = vector.broadcast %cst_3 : f32 to vector<64x1xf32>
    %10 = arith.mulf %8, %9 : vector<64x1xf32>
    %11 = arith.mulf %5, %5 : vector<64x1xf32>
    %12 = arith.subf %10, %11 : vector<64x1xf32>
    %cst_4 = arith.constant 0.000000e+00 : f32
    %13 = vector.broadcast %cst_4 : f32 to vector<64x1xf32>
    %14 = arith.maximumf %12, %13 : vector<64x1xf32>
    %15 = vector.broadcast %5 : vector<64x1xf32> to vector<64x128xf32>
    %16 = arith.subf %1, %15 : vector<64x128xf32>
    %cst_5 = arith.constant 9.99999974E-6 : f32
    %17 = vector.broadcast %cst_5 : f32 to vector<64x1xf32>
    %18 = arith.addf %14, %17 : vector<64x1xf32>
    %19 = math.rsqrt %18 : vector<64x1xf32>
    %20 = vector.broadcast %19 : vector<64x1xf32> to vector<64x128xf32>
    %21 = arith.mulf %16, %20 : vector<64x128xf32>
    %c0_6 = arith.constant 0 : index
    %c0_7 = arith.constant 0 : index
    %22 = vector.load %arg2[%c0_6, %c0_7] : memref<1x128xf32, #tpu.memory_space<vmem>>, vector<1x128xf32>
    %23 = vector.broadcast %22 : vector<1x128xf32> to vector<64x128xf32>
    %24 = arith.mulf %21, %23 : vector<64x128xf32>
    %c0_8 = arith.constant 0 : index
    %c0_9 = arith.constant 0 : index
    %25 = vector.load %arg3[%c0_8, %c0_9] : memref<1x128xf32, #tpu.memory_space<vmem>>, vector<1x128xf32>
    %26 = vector.broadcast %25 : vector<1x128xf32> to vector<64x128xf32>
    %27 = arith.addf %24, %26 : vector<64x128xf32>
    %28 = arith.truncf %27 : vector<64x128xf32> to vector<64x128xbf16>
    %c0_10 = arith.constant 0 : index
    %c0_11 = arith.constant 0 : index
    %29 = vector.load %arg4[%c0_10, %c0_11] : memref<128x128xbf16, #tpu.memory_space<vmem>>, vector<128x128xbf16>
    %cst_12 = arith.constant dense<0.000000e+00> : vector<64x128xf32>
    %30 = tpu.matmul %28, %29, %cst_12 {dimension_numbers = #tpu.dot_dimension_numbers<[1], [0], [0], [1], [0, 0, 1, 1], [], []>} : vector<64x128xbf16>, vector<128x128xbf16>, vector<64x128xf32> -> vector<64x128xf32>
    %c0_13 = arith.constant 0 : index
    %c0_14 = arith.constant 0 : index
    %31 = vector.load %arg5[%c0_13, %c0_14] : memref<1x128xf32, #tpu.memory_space<vmem>>, vector<1x128xf32>
    %32 = vector.broadcast %31 : vector<1x128xf32> to vector<64x128xf32>
    %33 = arith.addf %30, %32 : vector<64x128xf32>
    %cst_15 = arith.constant 0.000000e+00 : f32
    %34 = vector.broadcast %cst_15 : f32 to vector<64x128xf32>
    %35 = arith.maximumf %33, %34 : vector<64x128xf32>
    %36 = arith.truncf %35 : vector<64x128xf32> to vector<64x128xbf16>
    %c0_16 = arith.constant 0 : index
    %c0_17 = arith.constant 0 : index
    %37 = vector.load %arg6[%c0_16, %c0_17] : memref<128x128xbf16, #tpu.memory_space<vmem>>, vector<128x128xbf16>
    %cst_18 = arith.constant dense<0.000000e+00> : vector<64x128xf32>
    %38 = tpu.matmul %36, %37, %cst_18 {dimension_numbers = #tpu.dot_dimension_numbers<[1], [0], [0], [1], [0, 0, 1, 1], [], []>} : vector<64x128xbf16>, vector<128x128xbf16>, vector<64x128xf32> -> vector<64x128xf32>
    %c0_19 = arith.constant 0 : index
    %c0_20 = arith.constant 0 : index
    %39 = vector.load %arg7[%c0_19, %c0_20] : memref<1x128xf32, #tpu.memory_space<vmem>>, vector<1x128xf32>
    %40 = vector.broadcast %39 : vector<1x128xf32> to vector<64x128xf32>
    %41 = arith.addf %38, %40 : vector<64x128xf32>
    %42 = arith.truncf %41 : vector<64x128xf32> to vector<64x128xbf16>
    %c0_21 = arith.constant 0 : index
    %c0_22 = arith.constant 0 : index
    %43 = vector.load %arg8[%c0_21, %c0_22] : memref<64x128xbf16, #tpu.memory_space<vmem>>, vector<64x128xbf16>
    tpu.vector_store %arg8[%c0_21, %c0_22], %42 {strides = array<i32>} : memref<64x128xbf16, #tpu.memory_space<vmem>>, vector<64x128xbf16>,
    return
  }
  func.func @transform_0(%arg0: i32) -> (i32, i32) {
    %c0_i32 = arith.constant 0 : i32
    %c0_i32_0 = arith.constant 0 : i32
    return %arg0, %c0_i32 : i32, i32
  }
  func.func @transform_1(%arg0: i32) -> (i32, i32) {
    %c0_i32 = arith.constant 0 : i32
    %c0_i32_0 = arith.constant 0 : i32
    %c0_i32_1 = arith.constant 0 : i32
    return %c0_i32, %c0_i32_0 : i32, i32
  }
  func.func @transform_2(%arg0: i32) -> (i32, i32) {
    %c0_i32 = arith.constant 0 : i32
    %c0_i32_0 = arith.constant 0 : i32
    %c0_i32_1 = arith.constant 0 : i32
    return %c0_i32, %c0_i32_0 : i32, i32
  }
  func.func @transform_3(%arg0: i32) -> (i32, i32) {
    %c0_i32 = arith.constant 0 : i32
    %c0_i32_0 = arith.constant 0 : i32
    %c0_i32_1 = arith.constant 0 : i32
    return %c0_i32, %c0_i32_0 : i32, i32
  }
  func.func @transform_4(%arg0: i32) -> (i32, i32) {
    %c0_i32 = arith.constant 0 : i32
    %c0_i32_0 = arith.constant 0 : i32
    %c0_i32_1 = arith.constant 0 : i32
    return %c0_i32, %c0_i32_0 : i32, i32
  }
  func.func @transform_5(%arg0: i32) -> (i32, i32) {
    %c0_i32 = arith.constant 0 : i32
    %c0_i32_0 = arith.constant 0 : i32
    %c0_i32_1 = arith.constant 0 : i32
    return %c0_i32, %c0_i32_0 : i32, i32
  }
  func.func @transform_6(%arg0: i32) -> (i32, i32) {
    %c0_i32 = arith.constant 0 : i32
    %c0_i32_0 = arith.constant 0 : i32
    %c0_i32_1 = arith.constant 0 : i32
    return %c0_i32, %c0_i32_0 : i32, i32
  }
  func.func @transform_7(%arg0: i32) -> (i32, i32) {
    %c0_i32 = arith.constant 0 : i32
    %c0_i32_0 = arith.constant 0 : i32
    return %arg0, %c0_i32 : i32, i32
  }
}

module attributes {stable_mosaic.version = 11 : i64} {
  func.func @_fused_mlp_kernel(%arg0: i32, %arg1: memref<64x128xbf16, #tpu.memory_space<vmem>>, %arg2: memref<1x128xf32, #tpu.memory_space<vmem>>, %arg3: memref<1x128xf32, #tpu.memory_space<vmem>>, %arg4: memref<128x128xbf16, #tpu.memory_space<vmem>>, %arg5: memref<1x128xf32, #tpu.memory_space<vmem>>, %arg6: memref<128x128xbf16, #tpu.memory_space<vmem>>, %arg7: memref<1x128xf32, #tpu.memory_space<vmem>>, %arg8: memref<64x128xbf16, #tpu.memory_space<vmem>>) attributes {dimension_semantics = [#tpu.dimension_semantics<arbitrary>], iteration_bounds = array<i64: 1>, scalar_prefetch = 0 : i64, scratch_operands = 0 : i64, tpu.core_type = #tpu.core_type<tc>, window_params = [{transform_indices = @transform_0, window_bounds = array<i64: 64, 128>}, {pipeline_mode = #tpu.pipeline_mode<synchronous>, transform_indices = @transform_1, window_bounds = array<i64: 1, 128>}, {pipeline_mode = #tpu.pipeline_mode<synchronous>, transform_indices = @transform_2, window_bounds = array<i64: 1, 128>}, {pipeline_mode = #tpu.pipeline_mode<synchronous>, transform_indices = @transform_3, window_bounds = array<i64: 128, 128>}, {pipeline_mode = #tpu.pipeline_mode<synchronous>, transform_indices = @transform_4, window_bounds = array<i64: 1, 128>}, {pipeline_mode = #tpu.pipeline_mode<synchronous>, transform_indices = @transform_5, window_bounds = array<i64: 128, 128>}, {pipeline_mode = #tpu.pipeline_mode<synchronous>, transform_indices = @transform_6, window_bounds = array<i64: 1, 128>}, {transform_indices = @transform_7, window_bounds = array<i64: 64, 128>}]} {
    %c0 = arith.constant 0 : index
    %c0_0 = arith.constant 0 : index
    %0 = vector.load %arg1[%c0, %c0_0] : memref<64x128xbf16, #tpu.memory_space<vmem>>, vector<64x128xbf16>
    %1 = arith.extf %0 : vector<64x128xbf16> to vector<64x128xf32>
    %cst = arith.constant dense<0.000000e+00> : vector<64xf32>
    %2 = vector.multi_reduction <add>, %1, %cst [1] : vector<64x128xf32> to vector<64xf32>
    %3 = vector.shape_cast %2 : vector<64xf32> to vector<64x1xf32>
    %cst_1 = arith.constant 3.125000e-02 : f32
    %4 = vector.broadcast %cst_1 : f32 to vector<64x1xf32>
    %5 = arith.mulf %3, %4 : vector<64x1xf32>
    %6 = arith.mulf %1, %1 : vector<64x128xf32>
    %cst_2 = arith.constant dense<0.000000e+00> : vector<64xf32>
    %7 = vector.multi_reduction <add>, %6, %cst_2 [1] : vector<64x128xf32> to vector<64xf32>
    %8 = vector.shape_cast %7 : vector<64xf32> to vector<64x1xf32>
    %cst_3 = arith.constant 3.125000e-02 : f32
    %9 = vector.broadcast %cst_3 : f32 to vector<64x1xf32>
    %10 = arith.mulf %8, %9 : vector<64x1xf32>
    %11 = arith.mulf %5, %5 : vector<64x1xf32>
    %12 = arith.subf %10, %11 : vector<64x1xf32>
    %cst_4 = arith.constant 0.000000e+00 : f32
    %13 = vector.broadcast %cst_4 : f32 to vector<64x1xf32>
    %14 = arith.maximumf %12, %13 : vector<64x1xf32>
    %15 = vector.broadcast %5 : vector<64x1xf32> to vector<64x128xf32>
    %16 = arith.subf %1, %15 : vector<64x128xf32>
    %cst_5 = arith.constant 9.99999974E-6 : f32
    %17 = vector.broadcast %cst_5 : f32 to vector<64x1xf32>
    %18 = arith.addf %14, %17 : vector<64x1xf32>
    %19 = math.rsqrt %18 : vector<64x1xf32>
    %20 = vector.broadcast %19 : vector<64x1xf32> to vector<64x128xf32>
    %21 = arith.mulf %16, %20 : vector<64x128xf32>
    %c0_6 = arith.constant 0 : index
    %c0_7 = arith.constant 0 : index
    %22 = vector.load %arg2[%c0_6, %c0_7] : memref<1x128xf32, #tpu.memory_space<vmem>>, vector<1x128xf32>
    %23 = vector.broadcast %22 : vector<1x128xf32> to vector<64x128xf32>
    %24 = arith.mulf %21, %23 : vector<64x128xf32>
    %c0_8 = arith.constant 0 : index
    %c0_9 = arith.constant 0 : index
    %25 = vector.load %arg3[%c0_8, %c0_9] : memref<1x128xf32, #tpu.memory_space<vmem>>, vector<1x128xf32>
    %26 = vector.broadcast %25 : vector<1x128xf32> to vector<64x128xf32>
    %27 = arith.addf %24, %26 : vector<64x128xf32>
    %28 = arith.truncf %27 : vector<64x128xf32> to vector<64x128xbf16>
    %c0_10 = arith.constant 0 : index
    %c0_11 = arith.constant 0 : index
    %29 = vector.load %arg4[%c0_10, %c0_11] : memref<128x128xbf16, #tpu.memory_space<vmem>>, vector<128x128xbf16>
    %cst_12 = arith.constant dense<0.000000e+00> : vector<64x128xf32>
    %30 = tpu.matmul %28, %29, %cst_12 {dimension_numbers = #tpu.dot_dimension_numbers<[1], [0], [0], [1], [0, 0, 1, 1], [], []>} : vector<64x128xbf16>, vector<128x128xbf16>, vector<64x128xf32> -> vector<64x128xf32>
    %c0_13 = arith.constant 0 : index
    %c0_14 = arith.constant 0 : index
    %31 = vector.load %arg5[%c0_13, %c0_14] : memref<1x128xf32, #tpu.memory_space<vmem>>, vector<1x128xf32>
    %32 = vector.broadcast %31 : vector<1x128xf32> to vector<64x128xf32>
    %33 = arith.addf %30, %32 : vector<64x128xf32>
    %cst_15 = arith.constant 0.000000e+00 : f32
    %34 = vector.broadcast %cst_15 : f32 to vector<64x128xf32>
    %35 = arith.maximumf %33, %34 : vector<64x128xf32>
    %36 = arith.truncf %35 : vector<64x128xf32> to vector<64x128xbf16>
    %c0_16 = arith.constant 0 : index
    %c0_17 = arith.constant 0 : index
    %37 = vector.load %arg6[%c0_16, %c0_17] : memref<128x128xbf16, #tpu.memory_space<vmem>>, vector<128x128xbf16>
    %cst_18 = arith.constant dense<0.000000e+00> : vector<64x128xf32>
    %38 = tpu.matmul %36, %37, %cst_18 {dimension_numbers = #tpu.dot_dimension_numbers<[1], [0], [0], [1], [0, 0, 1, 1], [], []>} : vector<64x128xbf16>, vector<128x128xbf16>, vector<64x128xf32> -> vector<64x128xf32>
    %c0_19 = arith.constant 0 : index
    %c0_20 = arith.constant 0 : index
    %39 = vector.load %arg7[%c0_19, %c0_20] : memref<1x128xf32, #tpu.memory_space<vmem>>, vector<1x128xf32>
    %40 = vector.broadcast %39 : vector<1x128xf32> to vector<64x128xf32>
    %41 = arith.addf %38, %40 : vector<64x128xf32>
    %42 = arith.truncf %41 : vector<64x128xf32> to vector<64x128xbf16>
    %c0_21 = arith.constant 0 : index
    %c0_22 = arith.constant 0 : index
    %43 = vector.load %arg8[%c0_21, %c0_22] : memref<64x128xbf16, #tpu.memory_space<vmem>>, vector<64x128xbf16>
    tpu.vector_store %arg8[%c0_21, %c0_22], %42 {strides = array<i32>} : memref<64x128xbf16, #tpu.memory_space<vmem>>, vector<64x128xbf16>,
    return
  }
  func.func @transform_0(%arg0: i32) -> (i32, i32) {
    %c0_i32 = arith.constant 0 : i32
    %c0_i32_0 = arith.constant 0 : i32
    return %arg0, %c0_i32 : i32, i32
  }
  func.func @transform_1(%arg0: i32) -> (i32, i32) {
    %c0_i32 = arith.constant 0 : i32
    %c0_i32_0 = arith.constant 0 : i32
    %c0_i32_1 = arith.constant 0 : i32
    return %c0_i32, %c0_i32_0 : i32, i32
  }
  func.func @transform_2(%arg0: i32) -> (i32, i32) {
    %c0_i32 = arith.constant 0 : i32
    %c0_i32_0 = arith.constant 0 : i32
    %c0_i32_1 = arith.constant 0 : i32
    return %c0_i32, %c0_i32_0 : i32, i32
  }
  func.func @transform_3(%arg0: i32) -> (i32, i32) {
    %c0_i32 = arith.constant 0 : i32
    %c0_i32_0 = arith.constant 0 : i32
    %c0_i32_1 = arith.constant 0 : i32
    return %c0_i32, %c0_i32_0 : i32, i32
  }
  func.func @transform_4(%arg0: i32) -> (i32, i32) {
    %c0_i32 = arith.constant 0 : i32
    %c0_i32_0 = arith.constant 0 : i32
    %c0_i32_1 = arith.constant 0 : i32
    return %c0_i32, %c0_i32_0 : i32, i32
  }
  func.func @transform_5(%arg0: i32) -> (i32, i32) {
    %c0_i32 = arith.constant 0 : i32
    %c0_i32_0 = arith.constant 0 : i32
    %c0_i32_1 = arith.constant 0 : i32
    return %c0_i32, %c0_i32_0 : i32, i32
  }
  func.func @transform_6(%arg0: i32) -> (i32, i32) {
    %c0_i32 = arith.constant 0 : i32
    %c0_i32_0 = arith.constant 0 : i32
    %c0_i32_1 = arith.constant 0 : i32
    return %c0_i32, %c0_i32_0 : i32, i32
  }
  func.func @transform_7(%arg0: i32) -> (i32, i32) {
    %c0_i32 = arith.constant 0 : i32
    %c0_i32_0 = arith.constant 0 : i32
    return %arg0, %c0_i32 : i32, i32
  }
}

</mosaic_0001>

<bundles_post_ra>
// kernel: tpu_custom_call.1
= control target key start
LH: loop header
LB: loop body
LE: loop exit
PB: predicated region body
PF: predicated region fallthrough
CT: control target
= control target key end

     0   :  { %12 = vsyncpa [#allocation3], 0  ;;  %s1063_s0 = inlined_call_operand.hbm [shape: bf16[64,128], index: 0, kind: input, shape index: {}]   ;;  %s1064_s1 = inlined_call_operand.vmem [shape: f32[1,128], index: 1, kind: input, shape index: {}]   ;;  %s1065_s2 = inlined_call_operand.vmem [shape: f32[1,128], index: 2, kind: input, shape index: {}]   ;;  %s1066_s3 = inlined_call_operand.hbm [shape: bf16[128,128], index: 3, kind: input, shape index: {}]   ;;  %s1067_s4 = inlined_call_operand.vmem [shape: f32[1,128], index: 4, kind: input, shape index: {}]   ;;  %s1068_s5 = inlined_call_operand.hbm [shape: bf16[128,128], index: 5, kind: input, shape index: {}]   ;;  %s1069_s6 = inlined_call_operand.vmem [shape: f32[1,128], index: 6, kind: input, shape index: {}]   ;;  %s1070_s7 = inlined_call_operand.hbm [shape: bf16[64,128], index: 7, kind: output, shape index: {}]  }
   0x1   :  { %13 = vsyncpa [#allocation6], 0 }
   0x2   :  { %14 = vsyncpa [#allocation4], 0  ;;  %s855_s24 = smov [#allocation5]   ;;  %s856_s26 = smov [#allocation2]  }
   0x3   :  { %s36_s25 = sshll.u32 %s855_s24, 4  ;;  %s20_s27 = sshll.u32 %s856_s26, 4  ;;  %s37_s25 = int_to_ptr.vmem [resolvable:$true] %s36_s25  ;;  %s901_s27 = int_to_ptr.vmem [resolvable:$true] %s20_s27 }
   0x4   :  { %s761_s30 = scalar_lea.hbm %s1066_s3, 1024 }
   0x5   :  { %p762_p0 = scmp.ne.s32.totalorder %s1066_s3, %s761_s30  ;;  %p765_p1 = scmp.lt.u32.totalorder %s761_s30, %s1066_s3 }
   0x7   :  { %p767_p2 = pnand %p765_p1, %p762_p0 }
   0x9   :  { %770 = shalt.err (!%p767_p2)
}
   0xa   :  { %s771_s12 = scalar_lea.vmem %s37_s25, 1024  ;;  %p776_p4 = scmp.lt.s32.totalorder %s37_s25, %s37_s25 }
   0xb   :  { %p772_p3 = scmp.ne.s32.totalorder %s37_s25, %s771_s12  ;;  %p777_p5 = scmp.lt.s32.totalorder %s771_s12, %s771_s12 }
   0xd   :  { %p778_p6 = por %p777_p5, %p776_p4 }
   0xf   :  { %p779_p7 = pnand %p778_p6, %p772_p3 }
  0x11   :  { %782 = shalt.err (!%p779_p7)
}
  0x12   :  { %s857_s13 = smov 64   ;;  %s858_s14 = smov 4  }
  0x13   :  { %42 = dma.hbm_to_vmem [thread:$0]  %s1066_s3, 1024, %s37_s25, [#allocation6], %s857_s13, %s857_s13, %s858_s14  }
  0x14   :  { %s783_s19 = scalar_lea.hbm %s1063_s0, 512 }
  0x15   :  { %p784_p8 = scmp.ne.s32.totalorder %s1063_s0, %s783_s19  ;;  %p787_p9 = scmp.lt.u32.totalorder %s783_s19, %s1063_s0 }
  0x17   :  { %p789_p10 = pnand %p787_p9, %p784_p8 }
  0x19   :  { %792 = shalt.err (!%p789_p10)
}
  0x1a   :  { %s793_s24 = scalar_lea.vmem %s901_s27, 512  ;;  %p798_p12 = scmp.lt.s32.totalorder %s901_s27, %s901_s27 }
  0x1b   :  { %p794_p11 = scmp.ne.s32.totalorder %s901_s27, %s793_s24  ;;  %p799_p13 = scmp.lt.s32.totalorder %s793_s24, %s793_s24 }
  0x1d   :  { %p800_p0 = por %p799_p13, %p798_p12 }
  0x1f   :  { %p801_p1 = pnand %p800_p0, %p794_p11 }
  0x21   :  { %804 = shalt.err (!%p801_p1)
}
  0x22   :  { %26 = dma.hbm_to_vmem [thread:$0]  %s1063_s0, 512, %s901_s27, [#allocation3], %s857_s13, %s857_s13, %s858_s14  }
  0x23   :  { %s859_s26 = smov [#allocation7]   ;;  %s805_s8 = scalar_lea.hbm %s1068_s5, 1024 }
  0x24   :  { %s50_s28 = sshll.u32 %s859_s26, 4  ;;  %p806_p2 = scmp.ne.s32.totalorder %s1068_s5, %s805_s8  ;;  %s51_s28 = int_to_ptr.vmem [resolvable:$true] %s50_s28 }
  0x25   :  { %p809_p3 = scmp.lt.u32.totalorder %s805_s8, %s1068_s5 }
  0x27   :  { %p811_p4 = pnand %p809_p3, %p806_p2 }
  0x29   :  { %814 = shalt.err (!%p811_p4)
}
  0x2a   :  { %s815_s15 = scalar_lea.vmem %s51_s28, 1024  ;;  %p820_p6 = scmp.lt.s32.totalorder %s51_s28, %s51_s28 }
  0x2b   :  { %p816_p5 = scmp.ne.s32.totalorder %s51_s28, %s815_s15  ;;  %p821_p7 = scmp.lt.s32.totalorder %s815_s15, %s815_s15 }
  0x2d   :  { %p822_p8 = por %p821_p7, %p820_p6 }
  0x2f   :  { %p823_p9 = pnand %p822_p8, %p816_p5 }
  0x31   :  { %826 = shalt.err (!%p823_p9)
}
  0x32   :  { %56 = dma.hbm_to_vmem [thread:$0]  %s1068_s5, 1024, %s51_s28, [#allocation6], %s857_s13, %s857_s13, %s858_s14  }
  0x33   :  { %849 = dma.done.wait [#allocation3], 512  }
  0x34   :  { %850 = vsyncadd [#allocation3], 4294966784 }
  0x35   :  { %851 = dma.done.wait [#allocation6], 2048  }
  0x36   :  { %852 = vsyncadd [#allocation6], 4294965248  ;;  %v645_v0 = vld [vmem:[#allocation2 + $0x8] sm:$0xff]   ;;  %v610_v1 = vld [vmem:[#allocation2] sm:$0xff]   ;;  %s860_s20 = smov [#allocation8]  }
  0x37   :  { %v953_v2 = vunpack.c.l.bf16 %v645_v0  ;;  %v955_v3 = vunpack.c.l.bf16 %v610_v1  ;;  %v959_v4 = vunpack.c.h.bf16 %v645_v0  ;;  %v961_v5 = vunpack.c.h.bf16 %v610_v1  ;;  %v646_v10 = vld [vmem:[#allocation2 + $0x10] sm:$0xff]   ;;  %v647_v13 = vld [vmem:[#allocation2 + $0x18] sm:$0xff]   ;;  %v729_v16 = vld [vmem:[#allocation5] sm:$0xff]   ;;  %s560_s21 = sshll.u32 %s860_s20, 4  ;;  %s561_s21 = int_to_ptr.vmem [resolvable:$true] %s560_s21 }
  0x38   :  { %v973_v11 = vunpack.c.h.bf16 %v646_v10  ;;  %v975_v12 = vunpack.c.l.bf16 %v646_v10  ;;  %v979_v14 = vunpack.c.h.bf16 %v647_v13  ;;  %v981_v15 = vunpack.c.l.bf16 %v647_v13  ;;  %675 = vmatprep.subr.bf16.mxu0 %v729_v16  ;;  %v730_v21 = vld [vmem:[#allocation5 + $0x8] sm:$0xff]   ;;  %v731_v22 = vld [vmem:[#allocation5 + $0x10] sm:$0xff]   ;;  %v732_v23 = vld [vmem:[#allocation5 + $0x18] sm:$0xff]   ;;  %p832_p11 = scmp.lt.s32.totalorder %s561_s21, %s561_s21 }
  0x39   :  { %89 = vadd.xlane.f32.xlu1 %v953_v2  ;;  %85 = vadd.xlane.f32.xlu0 %v955_v3  ;;  %v110_v6 = vmul.f32 %v961_v5, %v961_v5  ;;  %v109_v7 = vmul.f32 %v955_v3, %v955_v3  ;;  %v112_v8 = vmul.f32 %v959_v4, %v959_v4  ;;  %v733_v24 = vld [vmem:[#allocation5 + $0x20] sm:$0xff]   ;;  %v734_v25 = vld [vmem:[#allocation5 + $0x28] sm:$0xff]   ;;  %v735_v26 = vld [vmem:[#allocation5 + $0x30] sm:$0xff]  }
  0x3a   :  { %v111_v9 = vmul.f32 %v953_v2, %v953_v2  ;;  %v114_v17 = vmul.f32 %v973_v11, %v973_v11  ;;  %v113_v18 = vmul.f32 %v975_v12, %v975_v12  ;;  %676 = vmatpush3.bf16.msra.mxu0 %v729_v16  ;;  %v116_v19 = vmul.f32 %v979_v14, %v979_v14  ;;  %v736_v27 = vld [vmem:[#allocation5 + $0x38] sm:$0xff]   ;;  %v737_v28 = vld [vmem:[#allocation7] sm:$0xff]   ;;  %v738_v29 = vld [vmem:[#allocation7 + $0x8] sm:$0xff]  }
  0x3b   :  { %v115_v20 = vmul.f32 %v981_v15, %v981_v15  ;;  %677 = vmatprep.subr.bf16.mxu0 %v730_v21  ;;  %699 = vmatprep.subr.bf16.mxu1 %v737_v28  ;;  %v739_v30 = vld [vmem:[#allocation7 + $0x10] sm:$0xff]   ;;  %v740_v31 = vld [vmem:[#allocation7 + $0x18] sm:$0xff]   ;;  %v741_v32 = vld [vmem:[#allocation7 + $0x20] sm:$0xff]  }
  0x3c   :  { %700 = vmatpush3.bf16.msra.mxu1 %v737_v28  ;;  %v742_v33 = vld [vmem:[#allocation7 + $0x28] sm:$0xff]   ;;  %v573_v28 = vld [vmem:[%s1064_s1] ss:$0 sm:$0xff] }
  0x3d   :  { %91 = vadd.xlane.f32.xlu1 %v959_v4  ;;  %87 = vadd.xlane.f32.xlu0 %v961_v5 }
  0x3e   :  { %678 = vmatpush3.bf16.msra.mxu0 %v730_v21  ;;  %701 = vmatprep.subr.bf16.mxu1 %v738_v29 }
  0x3f   :  { %679 = vmatprep.subr.bf16.mxu0 %v731_v22 }
  0x40   :  { %702 = vmatpush3.bf16.msra.mxu1 %v738_v29 }
  0x41   :  { %119 = vadd.xlane.f32.xlu1 %v110_v6  ;;  %117 = vadd.xlane.f32.xlu0 %v109_v7 }
  0x42   :  { %680 = vmatpush3.bf16.msra.mxu0 %v731_v22  ;;  %703 = vmatprep.subr.bf16.mxu1 %v739_v30 }
  0x43   :  { %681 = vmatprep.subr.bf16.mxu0 %v732_v23 }
  0x44   :  { %704 = vmatpush3.bf16.msra.mxu1 %v739_v30 }
  0x45   :  { %123 = vadd.xlane.f32.xlu1 %v112_v8  ;;  %121 = vadd.xlane.f32.xlu0 %v111_v9 }
  0x46   :  { %682 = vmatpush3.bf16.msra.mxu0 %v732_v23  ;;  %705 = vmatprep.subr.bf16.mxu1 %v740_v31 }
  0x47   :  { %683 = vmatprep.subr.bf16.mxu0 %v733_v24 }
  0x48   :  { %706 = vmatpush3.bf16.msra.mxu1 %v740_v31 }
  0x49   :  { %95 = vadd.xlane.f32.xlu1 %v973_v11  ;;  %93 = vadd.xlane.f32.xlu0 %v975_v12 }
  0x4a   :  { %684 = vmatpush3.bf16.msra.mxu0 %v733_v24  ;;  %707 = vmatprep.subr.bf16.mxu1 %v741_v32 }
  0x4b   :  { %685 = vmatprep.subr.bf16.mxu0 %v734_v25 }
  0x4c   :  { %708 = vmatpush3.bf16.msra.mxu1 %v741_v32 }
  0x4d   :  { %99 = vadd.xlane.f32.xlu1 %v979_v14  ;;  %97 = vadd.xlane.f32.xlu0 %v981_v15 }
  0x4e   :  { %686 = vmatpush3.bf16.msra.mxu0 %v734_v25  ;;  %709 = vmatprep.subr.bf16.mxu1 %v742_v33 }
  0x4f   :  { %687 = vmatprep.subr.bf16.mxu0 %v735_v26 }
  0x50   :  { %710 = vmatpush3.bf16.msra.mxu1 %v742_v33 }
  0x51   :  { %127 = vadd.xlane.f32.xlu1 %v114_v17  ;;  %125 = vadd.xlane.f32.xlu0 %v113_v18 }
  0x52   :  { %688 = vmatpush3.bf16.msra.mxu0 %v735_v26 }
  0x53   :  { %689 = vmatprep.subr.bf16.mxu0 %v736_v27 }
  0x55   :  { %131 = vadd.xlane.f32.xlu1 %v116_v19  ;;  %129 = vadd.xlane.f32.xlu0 %v115_v20 }
  0x56   :  { %690 = vmatpush3.bf16.msra.mxu0 %v736_v27 }
  0xc6   :  { %v90_v34 = vpop.xlane.xlu1 %89  ;;  %v86_v35 = vpop.xlane.xlu0 %85 }
  0xc7   :  { %v993_v38 = vmul.f32 0.03125, %v86_v35  ;;  %v995_v40 = vmul.f32 0.03125, %v90_v34 }
  0xc9   :  { %v141_v44 = vmul.f32 %v993_v38, %v993_v38  ;;  %v143_v50 = vmul.f32 %v995_v40, %v995_v40  ;;  %v165_v30 = vsub.f32 %v955_v3, %v993_v38  ;;  %v167_v3 = vsub.f32 %v953_v2, %v995_v40 }
  0xca   :  { %v92_v36 = vpop.xlane.xlu1 %91  ;;  %v88_v37 = vpop.xlane.xlu0 %87 }
  0xcb   :  { %v102_v39 = vmul.f32 0.03125, %v88_v37  ;;  %v997_v41 = vmul.f32 0.03125, %v92_v36 }
  0xcd   :  { %v142_v45 = vmul.f32 %v102_v39, %v102_v39  ;;  %v144_v51 = vmul.f32 %v997_v41, %v997_v41  ;;  %v166_v24 = vsub.f32 %v961_v5, %v102_v39  ;;  %v168_v38 = vsub.f32 %v959_v4, %v997_v41 }
  0xce   :  { %v120_v42 = vpop.xlane.xlu1 %119  ;;  %v118_v43 = vpop.xlane.xlu0 %117 }
  0xcf   :  { %v134_v46 = vmul.f32 0.03125, %v120_v42  ;;  %v133_v47 = vmul.f32 0.03125, %v118_v43  ;;  %v574_v42 = vld [vmem:[%s1065_s2] ss:$0 sm:$0xff] }
  0xd1   :  { %v150_v48 = vsub.f32 %v134_v46, %v142_v45  ;;  %v149_v49 = vsub.f32 %v133_v47, %v141_v44 }
  0xd2   :  { %v124_v52 = vpop.xlane.xlu1 %123  ;;  %v122_v53 = vpop.xlane.xlu0 %121 }
  0xd3   :  { %v158_v54 = vmax.f32 %v150_v48, 0.0  ;;  %v157_v55 = vmax.f32 %v149_v49, 0.0  ;;  %v136_v56 = vmul.f32 0.03125, %v124_v52  ;;  %v135_v57 = vmul.f32 0.03125, %v122_v53 }
  0xd5   :  { %v174_v58 = vadd.f32 1e-05, %v158_v54  ;;  %v173_v59 = vadd.f32 1e-05, %v157_v55  ;;  %v152_v60 = vsub.f32 %v136_v56, %v144_v51  ;;  %v151_v61 = vsub.f32 %v135_v57, %v143_v50 }
  0xd6   :  { %v96_v62 = vpop.xlane.xlu1 %95  ;;  %v94_v63 = vpop.xlane.xlu0 %93 }
  0xd7   :  { %745 = vrsqrt.f32 %v174_v58  ;;  %v160_v0 = vmax.f32 %v152_v60, 0.0  ;;  %v159_v1 = vmax.f32 %v151_v61, 0.0  ;;  %v1005_v10 = vmul.f32 0.03125, %v96_v62 }
  0xd8   :  { %747 = vrsqrt.f32 %v173_v59  ;;  %v1007_v13 = vmul.f32 0.03125, %v94_v63 }
  0xd9   :  { %v176_v6 = vadd.f32 1e-05, %v160_v0  ;;  %v175_v7 = vadd.f32 1e-05, %v159_v1  ;;  %v146_v20 = vmul.f32 %v1005_v10, %v1005_v10  ;;  %v170_v62 = vsub.f32 %v973_v11, %v1005_v10 }
  0xda   :  { %v100_v8 = vpop.xlane.xlu1 %99  ;;  %v98_v9 = vpop.xlane.xlu0 %97  ;;  %v145_v21 = vmul.f32 %v1007_v13, %v1007_v13  ;;  %v169_v0 = vsub.f32 %v975_v12, %v1007_v13 }
  0xdb   :  { %749 = vrsqrt.f32 %v176_v6  ;;  %v1009_v16 = vmul.f32 0.03125, %v100_v8  ;;  %v1011_v17 = vmul.f32 0.03125, %v98_v9 }
  0xdc   :  { %751 = vrsqrt.f32 %v175_v7 }
  0xdd   :  { %v148_v31 = vmul.f32 %v1009_v16, %v1009_v16  ;;  %v147_v32 = vmul.f32 %v1011_v17, %v1011_v17  ;;  %v172_v8 = vsub.f32 %v979_v14, %v1009_v16  ;;  %v743_v14 = vld [vmem:[#allocation7 + $0x30] sm:$0xff]   ;;  %v744_v16 = vld [vmem:[#allocation7 + $0x38] sm:$0xff]  }
  0xde   :  { %v128_v18 = vpop.xlane.xlu1 %127  ;;  %v126_v19 = vpop.xlane.xlu0 %125  ;;  %711 = vmatprep.subr.bf16.mxu1 %v743_v14 }
  0xdf   :  { %v138_v22 = vmul.f32 0.03125, %v128_v18  ;;  %v137_v23 = vmul.f32 0.03125, %v126_v19  ;;  %v171_v19 = vsub.f32 %v981_v15, %v1011_v17  ;;  %712 = vmatpush3.bf16.msra.mxu1 %v743_v14  ;;  %v575_v15 = vld [vmem:[%s1067_s4] ss:$0 sm:$0xff] }
  0xe0   :  { %713 = vmatprep.subr.bf16.mxu1 %v744_v16 }
  0xe1   :  { %v746_v25 = vpop.eup %745  ;;  %v154_v26 = vsub.f32 %v138_v22, %v146_v20  ;;  %v153_v27 = vsub.f32 %v137_v23, %v145_v21 }
  0xe2   :  { %v748_v29 = vpop.eup %747  ;;  %v132_v33 = vpop.xlane.xlu1 %131  ;;  %v190_v5 = vmul.f32 %v746_v25, %v166_v24 }
  0xe3   :  { %v130_v34 = vpop.xlane.xlu0 %129  ;;  %v162_v35 = vmax.f32 %v154_v26, 0.0  ;;  %v161_v36 = vmax.f32 %v153_v27, 0.0  ;;  %v140_v37 = vmul.f32 0.03125, %v132_v33  ;;  %v189_v43 = vmul.f32 %v748_v29, %v165_v30  ;;  %714 = vmatpush3.bf16.msra.mxu1 %v744_v16 }
  0xe4   :  { %v139_v39 = vmul.f32 0.03125, %v130_v34  ;;  %v205_v44 = vmul.f32 %v573_v28, %v190_v5 }
  0xe5   :  { %v750_v45 = vpop.eup %749  ;;  %v178_v46 = vadd.f32 1e-05, %v162_v35  ;;  %v177_v47 = vadd.f32 1e-05, %v161_v36  ;;  %v156_v48 = vsub.f32 %v140_v37, %v148_v31  ;;  %v204_v51 = vmul.f32 %v573_v28, %v189_v43 }
  0xe6   :  { %v155_v49 = vsub.f32 %v139_v39, %v147_v32  ;;  %v752_v50 = vpop.eup %751  ;;  %v220_v52 = vadd.f32 %v574_v42, %v205_v44  ;;  %v192_v53 = vmul.f32 %v750_v45, %v168_v38 }
  0xe7   :  { %753 = vrsqrt.f32 %v178_v46  ;;  %v164_v54 = vmax.f32 %v156_v48, 0.0  ;;  %v191_v56 = vmul.f32 %v752_v50, %v167_v3  ;;  %v219_v2 = vadd.f32 %v574_v42, %v204_v51 }
  0xe8   :  { %v163_v55 = vmax.f32 %v155_v49, 0.0  ;;  %755 = vrsqrt.f32 %v177_v47  ;;  %v207_v40 = vmul.f32 %v573_v28, %v192_v53 }
  0xe9   :  { %v180_v57 = vadd.f32 1e-05, %v164_v54  ;;  %v206_v41 = vmul.f32 %v573_v28, %v191_v56  ;;  %v227_v58 = vpack.c.bf16 %v220_v52, %v219_v2  ;;  %v584_v56 = vld [vmem:[%s1069_s6] ss:$0 sm:$0xff]  ;;  %s827_s6 = scalar_lea.vmem %s561_s21, 512 }
  0xea   :  { %v179_v4 = vadd.f32 1e-05, %v163_v55  ;;  %v222_v59 = vadd.f32 %v574_v42, %v207_v40  ;;  %p828_p10 = scmp.ne.s32.totalorder %s561_s21, %s827_s6  ;;  %p833_p12 = scmp.lt.s32.totalorder %s827_s6, %s827_s6 }
  0xeb   :  { %757 = vrsqrt.f32 %v180_v57  ;;  %v221_v60 = vadd.f32 %v574_v42, %v206_v41  ;;  %691 = vmatprep.mubr.bf16.mxu0 %v227_v58 }
  0xec   :  { %759 = vrsqrt.f32 %v179_v4  ;;  %p834_p13 = por %p833_p12, %p832_p11 }
  0xed   :  { %v228_v61 = vpack.c.bf16 %v222_v59, %v221_v60 }
  0xee   :  { %p835_p0 = pnand %p834_p13, %p828_p10 }
  0xef   :  { %692 = vmatmul.mubr.bf16.vlgmr.msra.gmra.mrb[0].mxu0 %v228_v61 }
  0xf1   :  { %v754_v63 = vpop.eup %753 }
  0xf2   :  { %v756_v1 = vpop.eup %755  ;;  %v194_v6 = vmul.f32 %v754_v63, %v170_v62 }
  0xf3   :  { %v193_v7 = vmul.f32 %v756_v1, %v169_v0 }
  0xf4   :  { %v209_v9 = vmul.f32 %v573_v28, %v194_v6 }
  0xf5   :  { %v758_v18 = vpop.eup %757  ;;  %v208_v20 = vmul.f32 %v573_v28, %v193_v7 }
  0xf6   :  { %v760_v21 = vpop.eup %759  ;;  %v224_v22 = vadd.f32 %v574_v42, %v209_v9  ;;  %v196_v23 = vmul.f32 %v758_v18, %v172_v8 }
  0xf7   :  { %v223_v11 = vadd.f32 %v574_v42, %v208_v20  ;;  %v195_v10 = vmul.f32 %v760_v21, %v171_v19 }
  0xf8   :  { %v211_v24 = vmul.f32 %v573_v28, %v196_v23 }
  0xf9   :  { %v229_v25 = vpack.c.bf16 %v224_v22, %v223_v11  ;;  %v210_v12 = vmul.f32 %v573_v28, %v195_v10 }
  0xfa   :  { %v226_v13 = vadd.f32 %v574_v42, %v211_v24 }
  0xfb   :  { %695 = vmatprep.mubr.bf16.mxu0 %v229_v25  ;;  %v225_v26 = vadd.f32 %v574_v42, %v210_v12 }
  0xfd   :  { %v230_v27 = vpack.c.bf16 %v226_v13, %v225_v26 }
  0xff   :  { %696 = vmatmul.mubr.bf16.gmra.mrb[4].mxu0 %v230_v27 }
 0x1c2   :  { %v693_v17 = vpop.f32.mrb[0].mxu0 }
 0x1c3   :  { %v345_v29 = vadd.f32 %v693_v17, %v575_v15  ;;  %v336_v30 = vpop.f32.mrb[1].mxu0 }
 0x1c4   :  { %v337_v31 = vadd.f32 %v575_v15, %v336_v30  ;;  %v694_v28 = vpop.f32.mrb[2].mxu0 }
 0x1c5   :  { %v348_v32 = vadd.f32 %v694_v28, %v575_v15  ;;  %v339_v33 = vpop.f32.mrb[3].mxu0  ;;  %v369_v5 = vmax.f32 %v345_v29, 0.0 }
 0x1c6   :  { %v340_v34 = vadd.f32 %v575_v15, %v339_v33  ;;  %v367_v36 = vmax.f32 %v337_v31, 0.0 }
 0x1c7   :  { %v370_v35 = vmax.f32 %v348_v32, 0.0 }
 0x1c8   :  { %v368_v37 = vmax.f32 %v340_v34, 0.0 }
 0x1c9   :  { %v376_v39 = vpack.c.bf16 %v370_v35, %v369_v5 }
 0x1ca   :  { %v375_v42 = vpack.c.bf16 %v368_v37, %v367_v36 }
 0x1cc   :  { %715 = vmatprep.mubr.bf16.mxu1 %v375_v42 }
 0x1cd   :  { %716 = vmatmul.mubr.bf16.vlgmr.msra.gmra.mrb[0].mxu1 %v376_v39 }
 0x1d2   :  { %v697_v3 = vpop.f32.mrb[4].mxu0 }
 0x1d3   :  { %v361_v38 = vadd.f32 %v697_v3, %v575_v15  ;;  %v352_v43 = vpop.f32.mrb[5].mxu0 }
 0x1d4   :  { %v353_v44 = vadd.f32 %v575_v15, %v352_v43  ;;  %v698_v45 = vpop.f32.mrb[6].mxu0 }
 0x1d5   :  { %v364_v46 = vadd.f32 %v698_v45, %v575_v15  ;;  %v355_v47 = vpop.f32.mrb[7].mxu0  ;;  %v373_v49 = vmax.f32 %v361_v38, 0.0 }
 0x1d6   :  { %v356_v48 = vadd.f32 %v575_v15, %v355_v47  ;;  %v371_v51 = vmax.f32 %v353_v44, 0.0 }
 0x1d7   :  { %v374_v50 = vmax.f32 %v364_v46, 0.0 }
 0x1d8   :  { %v372_v52 = vmax.f32 %v356_v48, 0.0 }
 0x1d9   :  { %v378_v53 = vpack.c.bf16 %v374_v50, %v373_v49 }
 0x1da   :  { %v377_v54 = vpack.c.bf16 %v372_v52, %v371_v51 }
 0x1dc   :  { %719 = vmatprep.mubr.bf16.mxu1 %v377_v54 }
 0x1dd   :  { %720 = vmatmul.mubr.bf16.gmra.mrb[4].mxu1 %v378_v53 }
 0x2a0   :  { %v717_v55 = vpop.f32.mrb[0].mxu1 }
 0x2a1   :  { %v484_v2 = vpop.f32.mrb[1].mxu1  ;;  %v493_v57 = vadd.f32 %v717_v55, %v584_v56 }
 0x2a2   :  { %v718_v40 = vpop.f32.mrb[2].mxu1  ;;  %v485_v58 = vadd.f32 %v584_v56, %v484_v2 }
 0x2a3   :  { %v496_v4 = vadd.f32 %v718_v40, %v584_v56  ;;  %v487_v41 = vpop.f32.mrb[3].mxu1 }
 0x2a4   :  { %v488_v59 = vadd.f32 %v584_v56, %v487_v41 }
 0x2a5   :  { %v633_v60 = vpack.c.bf16 %v496_v4, %v493_v57 }
 0x2a6   :  { %v628_v61 = vpack.c.bf16 %v488_v59, %v485_v58 }
 0x2a7   :  { %648 = vst [vmem:[#allocation8 + $0x8] sm:$0xff] %v633_v60  }
 0x2a8   :  { %629 = vst [vmem:[#allocation8] sm:$0xff] %v628_v61  }
 0x2b0   :  { %v721_v62 = vpop.f32.mrb[4].mxu1 }
 0x2b1   :  { %v500_v63 = vpop.f32.mrb[5].mxu1  ;;  %v509_v1 = vadd.f32 %v721_v62, %v584_v56 }
 0x2b2   :  { %v722_v0 = vpop.f32.mrb[6].mxu1  ;;  %v501_v8 = vadd.f32 %v584_v56, %v500_v63 }
 0x2b3   :  { %v512_v6 = vadd.f32 %v722_v0, %v584_v56  ;;  %v503_v7 = vpop.f32.mrb[7].mxu1 }
 0x2b4   :  { %v504_v9 = vadd.f32 %v584_v56, %v503_v7 }
 0x2b5   :  { %v643_v18 = vpack.c.bf16 %v512_v6, %v509_v1 }
 0x2b6   :  { %v638_v19 = vpack.c.bf16 %v504_v9, %v501_v8 }
 0x2b7   :  { %650 = vst [vmem:[#allocation8 + $0x18] sm:$0xff] %v643_v18  }
 0x2b8   :  { %649 = vst [vmem:[#allocation8 + $0x10] sm:$0xff] %v638_v19  }
 0x2b9   :  { %838 = shalt.err (!%p835_p0)
}
 0x2ba   :  { %s839_s24 = scalar_lea.hbm %s1070_s7, 512 }
 0x2bb   :  { %p840_p1 = scmp.ne.s32.totalorder %s1070_s7, %s839_s24  ;;  %p843_p2 = scmp.lt.u32.totalorder %s839_s24, %s1070_s7 }
 0x2bd   :  { %p845_p3 = pnand %p843_p2, %p840_p1 }
 0x2bf   :  { %848 = shalt.err (!%p845_p3)
}
 0x2c0   :  { %566 = dma.vmem_to_hbm [thread:$0]  %s561_s21, 512, %s1070_s7, [#allocation4], %s857_s13, %s857_s13, %s858_s14  }
 0x2c1   :  { %853 = dma.done.wait [#allocation4], 512  }
 0x2c2   :  { %854 = vsyncadd [#allocation4], 4294966784 }
 0x2c3   :  { %570 = vsyncpa [#allocation3], 1 }
 0x2c4   :  { %571 = vsyncpa [#allocation6], 1 }
 0x2c5   :  { %572 = vsyncpa [#allocation4], 1 }

// kernel: tpu_custom_call.1
= control target key start
LH: loop header
LB: loop body
LE: loop exit
PB: predicated region body
PF: predicated region fallthrough
CT: control target
= control target key end

     0   :  { %12 = vsyncpa [#allocation3], 0  ;;  %s1063_s0 = inlined_call_operand.hbm [shape: bf16[64,128], index: 0, kind: input, shape index: {}]   ;;  %s1064_s1 = inlined_call_operand.vmem [shape: f32[1,128], index: 1, kind: input, shape index: {}]   ;;  %s1065_s2 = inlined_call_operand.vmem [shape: f32[1,128], index: 2, kind: input, shape index: {}]   ;;  %s1066_s3 = inlined_call_operand.hbm [shape: bf16[128,128], index: 3, kind: input, shape index: {}]   ;;  %s1067_s4 = inlined_call_operand.vmem [shape: f32[1,128], index: 4, kind: input, shape index: {}]   ;;  %s1068_s5 = inlined_call_operand.hbm [shape: bf16[128,128], index: 5, kind: input, shape index: {}]   ;;  %s1069_s6 = inlined_call_operand.vmem [shape: f32[1,128], index: 6, kind: input, shape index: {}]   ;;  %s1070_s7 = inlined_call_operand.hbm [shape: bf16[64,128], index: 7, kind: output, shape index: {}]  }
   0x1   :  { %13 = vsyncpa [#allocation6], 0 }
   0x2   :  { %14 = vsyncpa [#allocation4], 0  ;;  %s855_s24 = smov [#allocation5]   ;;  %s856_s26 = smov [#allocation2]  }
   0x3   :  { %s36_s25 = sshll.u32 %s855_s24, 4  ;;  %s20_s27 = sshll.u32 %s856_s26, 4  ;;  %s37_s25 = int_to_ptr.vmem [resolvable:$true] %s36_s25  ;;  %s901_s27 = int_to_ptr.vmem [resolvable:$true] %s20_s27 }
   0x4   :  { %s761_s30 = scalar_lea.hbm %s1066_s3, 1024 }
   0x5   :  { %p762_p0 = scmp.ne.s32.totalorder %s1066_s3, %s761_s30  ;;  %p765_p1 = scmp.lt.u32.totalorder %s761_s30, %s1066_s3 }
   0x7   :  { %p767_p2 = pnand %p765_p1, %p762_p0 }
   0x9   :  { %770 = shalt.err (!%p767_p2)
}
   0xa   :  { %s771_s12 = scalar_lea.vmem %s37_s25, 1024  ;;  %p776_p4 = scmp.lt.s32.totalorder %s37_s25, %s37_s25 }
   0xb   :  { %p772_p3 = scmp.ne.s32.totalorder %s37_s25, %s771_s12  ;;  %p777_p5 = scmp.lt.s32.totalorder %s771_s12, %s771_s12 }
   0xd   :  { %p778_p6 = por %p777_p5, %p776_p4 }
   0xf   :  { %p779_p7 = pnand %p778_p6, %p772_p3 }
  0x11   :  { %782 = shalt.err (!%p779_p7)
}
  0x12   :  { %s857_s13 = smov 64   ;;  %s858_s14 = smov 4  }
  0x13   :  { %42 = dma.hbm_to_vmem [thread:$0]  %s1066_s3, 1024, %s37_s25, [#allocation6], %s857_s13, %s857_s13, %s858_s14  }
  0x14   :  { %s783_s19 = scalar_lea.hbm %s1063_s0, 512 }
  0x15   :  { %p784_p8 = scmp.ne.s32.totalorder %s1063_s0, %s783_s19  ;;  %p787_p9 = scmp.lt.u32.totalorder %s783_s19, %s1063_s0 }
  0x17   :  { %p789_p10 = pnand %p787_p9, %p784_p8 }
  0x19   :  { %792 = shalt.err (!%p789_p10)
}
  0x1a   :  { %s793_s24 = scalar_lea.vmem %s901_s27, 512  ;;  %p798_p12 = scmp.lt.s32.totalorder %s901_s27, %s901_s27 }
  0x1b   :  { %p794_p11 = scmp.ne.s32.totalorder %s901_s27, %s793_s24  ;;  %p799_p13 = scmp.lt.s32.totalorder %s793_s24, %s793_s24 }
  0x1d   :  { %p800_p0 = por %p799_p13, %p798_p12 }
  0x1f   :  { %p801_p1 = pnand %p800_p0, %p794_p11 }
  0x21   :  { %804 = shalt.err (!%p801_p1)
}
  0x22   :  { %26 = dma.hbm_to_vmem [thread:$0]  %s1063_s0, 512, %s901_s27, [#allocation3], %s857_s13, %s857_s13, %s858_s14  }
  0x23   :  { %s859_s26 = smov [#allocation7]   ;;  %s805_s8 = scalar_lea.hbm %s1068_s5, 1024 }
  0x24   :  { %s50_s28 = sshll.u32 %s859_s26, 4  ;;  %p806_p2 = scmp.ne.s32.totalorder %s1068_s5, %s805_s8  ;;  %s51_s28 = int_to_ptr.vmem [resolvable:$true] %s50_s28 }
  0x25   :  { %p809_p3 = scmp.lt.u32.totalorder %s805_s8, %s1068_s5 }
  0x27   :  { %p811_p4 = pnand %p809_p3, %p806_p2 }
  0x29   :  { %814 = shalt.err (!%p811_p4)
}
  0x2a   :  { %s815_s15 = scalar_lea.vmem %s51_s28, 1024  ;;  %p820_p6 = scmp.lt.s32.totalorder %s51_s28, %s51_s28 }
  0x2b   :  { %p816_p5 = scmp.ne.s32.totalorder %s51_s28, %s815_s15  ;;  %p821_p7 = scmp.lt.s32.totalorder %s815_s15, %s815_s15 }
  0x2d   :  { %p822_p8 = por %p821_p7, %p820_p6 }
  0x2f   :  { %p823_p9 = pnand %p822_p8, %p816_p5 }
  0x31   :  { %826 = shalt.err (!%p823_p9)
}
  0x32   :  { %56 = dma.hbm_to_vmem [thread:$0]  %s1068_s5, 1024, %s51_s28, [#allocation6], %s857_s13, %s857_s13, %s858_s14  }
  0x33   :  { %849 = dma.done.wait [#allocation3], 512  }
  0x34   :  { %850 = vsyncadd [#allocation3], 4294966784 }
  0x35   :  { %851 = dma.done.wait [#allocation6], 2048  }
  0x36   :  { %852 = vsyncadd [#allocation6], 4294965248  ;;  %v645_v0 = vld [vmem:[#allocation2 + $0x8] sm:$0xff]   ;;  %v610_v1 = vld [vmem:[#allocation2] sm:$0xff]   ;;  %s860_s20 = smov [#allocation8]  }
  0x37   :  { %v953_v2 = vunpack.c.l.bf16 %v645_v0  ;;  %v955_v3 = vunpack.c.l.bf16 %v610_v1  ;;  %v959_v4 = vunpack.c.h.bf16 %v645_v0  ;;  %v961_v5 = vunpack.c.h.bf16 %v610_v1  ;;  %v646_v10 = vld [vmem:[#allocation2 + $0x10] sm:$0xff]   ;;  %v647_v13 = vld [vmem:[#allocation2 + $0x18] sm:$0xff]   ;;  %v729_v16 = vld [vmem:[#allocation5] sm:$0xff]   ;;  %s560_s21 = sshll.u32 %s860_s20, 4  ;;  %s561_s21 = int_to_ptr.vmem [resolvable:$true] %s560_s21 }
  0x38   :  { %v973_v11 = vunpack.c.h.bf16 %v646_v10  ;;  %v975_v12 = vunpack.c.l.bf16 %v646_v10  ;;  %v979_v14 = vunpack.c.h.bf16 %v647_v13  ;;  %v981_v15 = vunpack.c.l.bf16 %v647_v13  ;;  %675 = vmatprep.subr.bf16.mxu0 %v729_v16  ;;  %v730_v21 = vld [vmem:[#allocation5 + $0x8] sm:$0xff]   ;;  %v731_v22 = vld [vmem:[#allocation5 + $0x10] sm:$0xff]   ;;  %v732_v23 = vld [vmem:[#allocation5 + $0x18] sm:$0xff]   ;;  %p832_p11 = scmp.lt.s32.totalorder %s561_s21, %s561_s21 }
  0x39   :  { %89 = vadd.xlane.f32.xlu1 %v953_v2  ;;  %85 = vadd.xlane.f32.xlu0 %v955_v3  ;;  %v110_v6 = vmul.f32 %v961_v5, %v961_v5  ;;  %v109_v7 = vmul.f32 %v955_v3, %v955_v3  ;;  %v112_v8 = vmul.f32 %v959_v4, %v959_v4  ;;  %v733_v24 = vld [vmem:[#allocation5 + $0x20] sm:$0xff]   ;;  %v734_v25 = vld [vmem:[#allocation5 + $0x28] sm:$0xff]   ;;  %v735_v26 = vld [vmem:[#allocation5 + $0x30] sm:$0xff]  }
  0x3a   :  { %v111_v9 = vmul.f32 %v953_v2, %v953_v2  ;;  %v114_v17 = vmul.f32 %v973_v11, %v973_v11  ;;  %v113_v18 = vmul.f32 %v975_v12, %v975_v12  ;;  %676 = vmatpush3.bf16.msra.mxu0 %v729_v16  ;;  %v116_v19 = vmul.f32 %v979_v14, %v979_v14  ;;  %v736_v27 = vld [vmem:[#allocation5 + $0x38] sm:$0xff]   ;;  %v737_v28 = vld [vmem:[#allocation7] sm:$0xff]   ;;  %v738_v29 = vld [vmem:[#allocation7 + $0x8] sm:$0xff]  }
  0x3b   :  { %v115_v20 = vmul.f32 %v981_v15, %v981_v15  ;;  %677 = vmatprep.subr.bf16.mxu0 %v730_v21  ;;  %699 = vmatprep.subr.bf16.mxu1 %v737_v28  ;;  %v739_v30 = vld [vmem:[#allocation7 + $0x10] sm:$0xff]   ;;  %v740_v31 = vld [vmem:[#allocation7 + $0x18] sm:$0xff]   ;;  %v741_v32 = vld [vmem:[#allocation7 + $0x20] sm:$0xff]  }
  0x3c   :  { %700 = vmatpush3.bf16.msra.mxu1 %v737_v28  ;;  %v742_v33 = vld [vmem:[#allocation7 + $0x28] sm:$0xff]   ;;  %v573_v28 = vld [vmem:[%s1064_s1] ss:$0 sm:$0xff] }
  0x3d   :  { %91 = vadd.xlane.f32.xlu1 %v959_v4  ;;  %87 = vadd.xlane.f32.xlu0 %v961_v5 }
  0x3e   :  { %678 = vmatpush3.bf16.msra.mxu0 %v730_v21  ;;  %701 = vmatprep.subr.bf16.mxu1 %v738_v29 }
  0x3f   :  { %679 = vmatprep.subr.bf16.mxu0 %v731_v22 }
  0x40   :  { %702 = vmatpush3.bf16.msra.mxu1 %v738_v29 }
  0x41   :  { %119 = vadd.xlane.f32.xlu1 %v110_v6  ;;  %117 = vadd.xlane.f32.xlu0 %v109_v7 }
  0x42   :  { %680 = vmatpush3.bf16.msra.mxu0 %v731_v22  ;;  %703 = vmatprep.subr.bf16.mxu1 %v739_v30 }
  0x43   :  { %681 = vmatprep.subr.bf16.mxu0 %v732_v23 }
  0x44   :  { %704 = vmatpush3.bf16.msra.mxu1 %v739_v30 }
  0x45   :  { %123 = vadd.xlane.f32.xlu1 %v112_v8  ;;  %121 = vadd.xlane.f32.xlu0 %v111_v9 }
  0x46   :  { %682 = vmatpush3.bf16.msra.mxu0 %v732_v23  ;;  %705 = vmatprep.subr.bf16.mxu1 %v740_v31 }
  0x47   :  { %683 = vmatprep.subr.bf16.mxu0 %v733_v24 }
  0x48   :  { %706 = vmatpush3.bf16.msra.mxu1 %v740_v31 }
  0x49   :  { %95 = vadd.xlane.f32.xlu1 %v973_v11  ;;  %93 = vadd.xlane.f32.xlu0 %v975_v12 }
  0x4a   :  { %684 = vmatpush3.bf16.msra.mxu0 %v733_v24  ;;  %707 = vmatprep.subr.bf16.mxu1 %v741_v32 }
  0x4b   :  { %685 = vmatprep.subr.bf16.mxu0 %v734_v25 }
  0x4c   :  { %708 = vmatpush3.bf16.msra.mxu1 %v741_v32 }
  0x4d   :  { %99 = vadd.xlane.f32.xlu1 %v979_v14  ;;  %97 = vadd.xlane.f32.xlu0 %v981_v15 }
  0x4e   :  { %686 = vmatpush3.bf16.msra.mxu0 %v734_v25  ;;  %709 = vmatprep.subr.bf16.mxu1 %v742_v33 }
  0x4f   :  { %687 = vmatprep.subr.bf16.mxu0 %v735_v26 }
  0x50   :  { %710 = vmatpush3.bf16.msra.mxu1 %v742_v33 }
  0x51   :  { %127 = vadd.xlane.f32.xlu1 %v114_v17  ;;  %125 = vadd.xlane.f32.xlu0 %v113_v18 }
  0x52   :  { %688 = vmatpush3.bf16.msra.mxu0 %v735_v26 }
  0x53   :  { %689 = vmatprep.subr.bf16.mxu0 %v736_v27 }
  0x55   :  { %131 = vadd.xlane.f32.xlu1 %v116_v19  ;;  %129 = vadd.xlane.f32.xlu0 %v115_v20 }
  0x56   :  { %690 = vmatpush3.bf16.msra.mxu0 %v736_v27 }
  0xc6   :  { %v90_v34 = vpop.xlane.xlu1 %89  ;;  %v86_v35 = vpop.xlane.xlu0 %85 }
  0xc7   :  { %v993_v38 = vmul.f32 0.03125, %v86_v35  ;;  %v995_v40 = vmul.f32 0.03125, %v90_v34 }
  0xc9   :  { %v141_v44 = vmul.f32 %v993_v38, %v993_v38  ;;  %v143_v50 = vmul.f32 %v995_v40, %v995_v40  ;;  %v165_v30 = vsub.f32 %v955_v3, %v993_v38  ;;  %v167_v3 = vsub.f32 %v953_v2, %v995_v40 }
  0xca   :  { %v92_v36 = vpop.xlane.xlu1 %91  ;;  %v88_v37 = vpop.xlane.xlu0 %87 }
  0xcb   :  { %v102_v39 = vmul.f32 0.03125, %v88_v37  ;;  %v997_v41 = vmul.f32 0.03125, %v92_v36 }
  0xcd   :  { %v142_v45 = vmul.f32 %v102_v39, %v102_v39  ;;  %v144_v51 = vmul.f32 %v997_v41, %v997_v41  ;;  %v166_v24 = vsub.f32 %v961_v5, %v102_v39  ;;  %v168_v38 = vsub.f32 %v959_v4, %v997_v41 }
  0xce   :  { %v120_v42 = vpop.xlane.xlu1 %119  ;;  %v118_v43 = vpop.xlane.xlu0 %117 }
  0xcf   :  { %v134_v46 = vmul.f32 0.03125, %v120_v42  ;;  %v133_v47 = vmul.f32 0.03125, %v118_v43  ;;  %v574_v42 = vld [vmem:[%s1065_s2] ss:$0 sm:$0xff] }
  0xd1   :  { %v150_v48 = vsub.f32 %v134_v46, %v142_v45  ;;  %v149_v49 = vsub.f32 %v133_v47, %v141_v44 }
  0xd2   :  { %v124_v52 = vpop.xlane.xlu1 %123  ;;  %v122_v53 = vpop.xlane.xlu0 %121 }
  0xd3   :  { %v158_v54 = vmax.f32 %v150_v48, 0.0  ;;  %v157_v55 = vmax.f32 %v149_v49, 0.0  ;;  %v136_v56 = vmul.f32 0.03125, %v124_v52  ;;  %v135_v57 = vmul.f32 0.03125, %v122_v53 }
  0xd5   :  { %v174_v58 = vadd.f32 1e-05, %v158_v54  ;;  %v173_v59 = vadd.f32 1e-05, %v157_v55  ;;  %v152_v60 = vsub.f32 %v136_v56, %v144_v51  ;;  %v151_v61 = vsub.f32 %v135_v57, %v143_v50 }
  0xd6   :  { %v96_v62 = vpop.xlane.xlu1 %95  ;;  %v94_v63 = vpop.xlane.xlu0 %93 }
  0xd7   :  { %745 = vrsqrt.f32 %v174_v58  ;;  %v160_v0 = vmax.f32 %v152_v60, 0.0  ;;  %v159_v1 = vmax.f32 %v151_v61, 0.0  ;;  %v1005_v10 = vmul.f32 0.03125, %v96_v62 }
  0xd8   :  { %747 = vrsqrt.f32 %v173_v59  ;;  %v1007_v13 = vmul.f32 0.03125, %v94_v63 }
  0xd9   :  { %v176_v6 = vadd.f32 1e-05, %v160_v0  ;;  %v175_v7 = vadd.f32 1e-05, %v159_v1  ;;  %v146_v20 = vmul.f32 %v1005_v10, %v1005_v10  ;;  %v170_v62 = vsub.f32 %v973_v11, %v1005_v10 }
  0xda   :  { %v100_v8 = vpop.xlane.xlu1 %99  ;;  %v98_v9 = vpop.xlane.xlu0 %97  ;;  %v145_v21 = vmul.f32 %v1007_v13, %v1007_v13  ;;  %v169_v0 = vsub.f32 %v975_v12, %v1007_v13 }
  0xdb   :  { %749 = vrsqrt.f32 %v176_v6  ;;  %v1009_v16 = vmul.f32 0.03125, %v100_v8  ;;  %v1011_v17 = vmul.f32 0.03125, %v98_v9 }
  0xdc   :  { %751 = vrsqrt.f32 %v175_v7 }
  0xdd   :  { %v148_v31 = vmul.f32 %v1009_v16, %v1009_v16  ;;  %v147_v32 = vmul.f32 %v1011_v17, %v1011_v17  ;;  %v172_v8 = vsub.f32 %v979_v14, %v1009_v16  ;;  %v743_v14 = vld [vmem:[#allocation7 + $0x30] sm:$0xff]   ;;  %v744_v16 = vld [vmem:[#allocation7 + $0x38] sm:$0xff]  }
  0xde   :  { %v128_v18 = vpop.xlane.xlu1 %127  ;;  %v126_v19 = vpop.xlane.xlu0 %125  ;;  %711 = vmatprep.subr.bf16.mxu1 %v743_v14 }
  0xdf   :  { %v138_v22 = vmul.f32 0.03125, %v128_v18  ;;  %v137_v23 = vmul.f32 0.03125, %v126_v19  ;;  %v171_v19 = vsub.f32 %v981_v15, %v1011_v17  ;;  %712 = vmatpush3.bf16.msra.mxu1 %v743_v14  ;;  %v575_v15 = vld [vmem:[%s1067_s4] ss:$0 sm:$0xff] }
  0xe0   :  { %713 = vmatprep.subr.bf16.mxu1 %v744_v16 }
  0xe1   :  { %v746_v25 = vpop.eup %745  ;;  %v154_v26 = vsub.f32 %v138_v22, %v146_v20  ;;  %v153_v27 = vsub.f32 %v137_v23, %v145_v21 }
  0xe2   :  { %v748_v29 = vpop.eup %747  ;;  %v132_v33 = vpop.xlane.xlu1 %131  ;;  %v190_v5 = vmul.f32 %v746_v25, %v166_v24 }
  0xe3   :  { %v130_v34 = vpop.xlane.xlu0 %129  ;;  %v162_v35 = vmax.f32 %v154_v26, 0.0  ;;  %v161_v36 = vmax.f32 %v153_v27, 0.0  ;;  %v140_v37 = vmul.f32 0.03125, %v132_v33  ;;  %v189_v43 = vmul.f32 %v748_v29, %v165_v30  ;;  %714 = vmatpush3.bf16.msra.mxu1 %v744_v16 }
  0xe4   :  { %v139_v39 = vmul.f32 0.03125, %v130_v34  ;;  %v205_v44 = vmul.f32 %v573_v28, %v190_v5 }
  0xe5   :  { %v750_v45 = vpop.eup %749  ;;  %v178_v46 = vadd.f32 1e-05, %v162_v35  ;;  %v177_v47 = vadd.f32 1e-05, %v161_v36  ;;  %v156_v48 = vsub.f32 %v140_v37, %v148_v31  ;;  %v204_v51 = vmul.f32 %v573_v28, %v189_v43 }
  0xe6   :  { %v155_v49 = vsub.f32 %v139_v39, %v147_v32  ;;  %v752_v50 = vpop.eup %751  ;;  %v220_v52 = vadd.f32 %v574_v42, %v205_v44  ;;  %v192_v53 = vmul.f32 %v750_v45, %v168_v38 }
  0xe7   :  { %753 = vrsqrt.f32 %v178_v46  ;;  %v164_v54 = vmax.f32 %v156_v48, 0.0  ;;  %v191_v56 = vmul.f32 %v752_v50, %v167_v3  ;;  %v219_v2 = vadd.f32 %v574_v42, %v204_v51 }
  0xe8   :  { %v163_v55 = vmax.f32 %v155_v49, 0.0  ;;  %755 = vrsqrt.f32 %v177_v47  ;;  %v207_v40 = vmul.f32 %v573_v28, %v192_v53 }
  0xe9   :  { %v180_v57 = vadd.f32 1e-05, %v164_v54  ;;  %v206_v41 = vmul.f32 %v573_v28, %v191_v56  ;;  %v227_v58 = vpack.c.bf16 %v220_v52, %v219_v2  ;;  %v584_v56 = vld [vmem:[%s1069_s6] ss:$0 sm:$0xff]  ;;  %s827_s6 = scalar_lea.vmem %s561_s21, 512 }
  0xea   :  { %v179_v4 = vadd.f32 1e-05, %v163_v55  ;;  %v222_v59 = vadd.f32 %v574_v42, %v207_v40  ;;  %p828_p10 = scmp.ne.s32.totalorder %s561_s21, %s827_s6  ;;  %p833_p12 = scmp.lt.s32.totalorder %s827_s6, %s827_s6 }
  0xeb   :  { %757 = vrsqrt.f32 %v180_v57  ;;  %v221_v60 = vadd.f32 %v574_v42, %v206_v41  ;;  %691 = vmatprep.mubr.bf16.mxu0 %v227_v58 }
  0xec   :  { %759 = vrsqrt.f32 %v179_v4  ;;  %p834_p13 = por %p833_p12, %p832_p11 }
  0xed   :  { %v228_v61 = vpack.c.bf16 %v222_v59, %v221_v60 }
  0xee   :  { %p835_p0 = pnand %p834_p13, %p828_p10 }
  0xef   :  { %692 = vmatmul.mubr.bf16.vlgmr.msra.gmra.mrb[0].mxu0 %v228_v61 }
  0xf1   :  { %v754_v63 = vpop.eup %753 }
  0xf2   :  { %v756_v1 = vpop.eup %755  ;;  %v194_v6 = vmul.f32 %v754_v63, %v170_v62 }
  0xf3   :  { %v193_v7 = vmul.f32 %v756_v1, %v169_v0 }
  0xf4   :  { %v209_v9 = vmul.f32 %v573_v28, %v194_v6 }
  0xf5   :  { %v758_v18 = vpop.eup %757  ;;  %v208_v20 = vmul.f32 %v573_v28, %v193_v7 }
  0xf6   :  { %v760_v21 = vpop.eup %759  ;;  %v224_v22 = vadd.f32 %v574_v42, %v209_v9  ;;  %v196_v23 = vmul.f32 %v758_v18, %v172_v8 }
  0xf7   :  { %v223_v11 = vadd.f32 %v574_v42, %v208_v20  ;;  %v195_v10 = vmul.f32 %v760_v21, %v171_v19 }
  0xf8   :  { %v211_v24 = vmul.f32 %v573_v28, %v196_v23 }
  0xf9   :  { %v229_v25 = vpack.c.bf16 %v224_v22, %v223_v11  ;;  %v210_v12 = vmul.f32 %v573_v28, %v195_v10 }
  0xfa   :  { %v226_v13 = vadd.f32 %v574_v42, %v211_v24 }
  0xfb   :  { %695 = vmatprep.mubr.bf16.mxu0 %v229_v25  ;;  %v225_v26 = vadd.f32 %v574_v42, %v210_v12 }
  0xfd   :  { %v230_v27 = vpack.c.bf16 %v226_v13, %v225_v26 }
  0xff   :  { %696 = vmatmul.mubr.bf16.gmra.mrb[4].mxu0 %v230_v27 }
 0x1c2   :  { %v693_v17 = vpop.f32.mrb[0].mxu0 }
 0x1c3   :  { %v345_v29 = vadd.f32 %v693_v17, %v575_v15  ;;  %v336_v30 = vpop.f32.mrb[1].mxu0 }
 0x1c4   :  { %v337_v31 = vadd.f32 %v575_v15, %v336_v30  ;;  %v694_v28 = vpop.f32.mrb[2].mxu0 }
 0x1c5   :  { %v348_v32 = vadd.f32 %v694_v28, %v575_v15  ;;  %v339_v33 = vpop.f32.mrb[3].mxu0  ;;  %v369_v5 = vmax.f32 %v345_v29, 0.0 }
 0x1c6   :  { %v340_v34 = vadd.f32 %v575_v15, %v339_v33  ;;  %v367_v36 = vmax.f32 %v337_v31, 0.0 }
 0x1c7   :  { %v370_v35 = vmax.f32 %v348_v32, 0.0 }
 0x1c8   :  { %v368_v37 = vmax.f32 %v340_v34, 0.0 }
 0x1c9   :  { %v376_v39 = vpack.c.bf16 %v370_v35, %v369_v5 }
 0x1ca   :  { %v375_v42 = vpack.c.bf16 %v368_v37, %v367_v36 }
 0x1cc   :  { %715 = vmatprep.mubr.bf16.mxu1 %v375_v42 }
 0x1cd   :  { %716 = vmatmul.mubr.bf16.vlgmr.msra.gmra.mrb[0].mxu1 %v376_v39 }
 0x1d2   :  { %v697_v3 = vpop.f32.mrb[4].mxu0 }
 0x1d3   :  { %v361_v38 = vadd.f32 %v697_v3, %v575_v15  ;;  %v352_v43 = vpop.f32.mrb[5].mxu0 }
 0x1d4   :  { %v353_v44 = vadd.f32 %v575_v15, %v352_v43  ;;  %v698_v45 = vpop.f32.mrb[6].mxu0 }
 0x1d5   :  { %v364_v46 = vadd.f32 %v698_v45, %v575_v15  ;;  %v355_v47 = vpop.f32.mrb[7].mxu0  ;;  %v373_v49 = vmax.f32 %v361_v38, 0.0 }
 0x1d6   :  { %v356_v48 = vadd.f32 %v575_v15, %v355_v47  ;;  %v371_v51 = vmax.f32 %v353_v44, 0.0 }
 0x1d7   :  { %v374_v50 = vmax.f32 %v364_v46, 0.0 }
 0x1d8   :  { %v372_v52 = vmax.f32 %v356_v48, 0.0 }
 0x1d9   :  { %v378_v53 = vpack.c.bf16 %v374_v50, %v373_v49 }
 0x1da   :  { %v377_v54 = vpack.c.bf16 %v372_v52, %v371_v51 }
 0x1dc   :  { %719 = vmatprep.mubr.bf16.mxu1 %v377_v54 }
 0x1dd   :  { %720 = vmatmul.mubr.bf16.gmra.mrb[4].mxu1 %v378_v53 }
 0x2a0   :  { %v717_v55 = vpop.f32.mrb[0].mxu1 }
 0x2a1   :  { %v484_v2 = vpop.f32.mrb[1].mxu1  ;;  %v493_v57 = vadd.f32 %v717_v55, %v584_v56 }
 0x2a2   :  { %v718_v40 = vpop.f32.mrb[2].mxu1  ;;  %v485_v58 = vadd.f32 %v584_v56, %v484_v2 }
 0x2a3   :  { %v496_v4 = vadd.f32 %v718_v40, %v584_v56  ;;  %v487_v41 = vpop.f32.mrb[3].mxu1 }
 0x2a4   :  { %v488_v59 = vadd.f32 %v584_v56, %v487_v41 }
 0x2a5   :  { %v633_v60 = vpack.c.bf16 %v496_v4, %v493_v57 }
 0x2a6   :  { %v628_v61 = vpack.c.bf16 %v488_v59, %v485_v58 }
 0x2a7   :  { %648 = vst [vmem:[#allocation8 + $0x8] sm:$0xff] %v633_v60  }
 0x2a8   :  { %629 = vst [vmem:[#allocation8] sm:$0xff] %v628_v61  }
 0x2b0   :  { %v721_v62 = vpop.f32.mrb[4].mxu1 }
 0x2b1   :  { %v500_v63 = vpop.f32.mrb[5].mxu1  ;;  %v509_v1 = vadd.f32 %v721_v62, %v584_v56 }
 0x2b2   :  { %v722_v0 = vpop.f32.mrb[6].mxu1  ;;  %v501_v8 = vadd.f32 %v584_v56, %v500_v63 }
 0x2b3   :  { %v512_v6 = vadd.f32 %v722_v0, %v584_v56  ;;  %v503_v7 = vpop.f32.mrb[7].mxu1 }
 0x2b4   :  { %v504_v9 = vadd.f32 %v584_v56, %v503_v7 }
 0x2b5   :  { %v643_v18 = vpack.c.bf16 %v512_v6, %v509_v1 }
 0x2b6   :  { %v638_v19 = vpack.c.bf16 %v504_v9, %v501_v8 }
 0x2b7   :  { %650 = vst [vmem:[#allocation8 + $0x18] sm:$0xff] %v643_v18  }
 0x2b8   :  { %649 = vst [vmem:[#allocation8 + $0x10] sm:$0xff] %v638_v19  }
 0x2b9   :  { %838 = shalt.err (!%p835_p0)
}
 0x2ba   :  { %s839_s24 = scalar_lea.hbm %s1070_s7, 512 }
 0x2bb   :  { %p840_p1 = scmp.ne.s32.totalorder %s1070_s7, %s839_s24  ;;  %p843_p2 = scmp.lt.u32.totalorder %s839_s24, %s1070_s7 }
 0x2bd   :  { %p845_p3 = pnand %p843_p2, %p840_p1 }
 0x2bf   :  { %848 = shalt.err (!%p845_p3)
}
 0x2c0   :  { %566 = dma.vmem_to_hbm [thread:$0]  %s561_s21, 512, %s1070_s7, [#allocation4], %s857_s13, %s857_s13, %s858_s14  }
 0x2c1   :  { %853 = dma.done.wait [#allocation4], 512  }
 0x2c2   :  { %854 = vsyncadd [#allocation4], 4294966784 }
 0x2c3   :  { %570 = vsyncpa [#allocation3], 1 }
 0x2c4   :  { %571 = vsyncpa [#allocation6], 1 }
 0x2c5   :  { %572 = vsyncpa [#allocation4], 1 }

</bundles_post_ra>
